<compile_context>
chip_gen: v6e
topology: v6e:2x2x1
jax: 0.10.0
libtpu: 0.0.40
codegen_flags: <defaults>
</compile_context>

<pallas_src>
import functools

import jax
import jax.numpy as jnp
from jax import lax
from jax.experimental import pallas as pl
from jax.experimental.pallas import tpu as pltpu


# ---------------------------------------------------------------------------
# Kernel
# ---------------------------------------------------------------------------
def _nais_attention_kernel(q_ref, ctx_ref, mask_l_ref, mask_s_ref, w_ref,
                           b_ref, h_ref, out_ref, attn_ref, *,
                           beta, activation):
    """One batch tile of the NAIS attention forward pass.

    q_ref      : (TB, D)      query tile
    ctx_ref    : (TB, L, D)   context tile
    mask_l_ref : (TB, L)      mask, L on lanes    (logits / attn output)
    mask_s_ref : (TB, L, 1)   mask, L on sublanes (broadcasts over D)
    w_ref      : (D, D)       nn.Linear weight, torch (out, in) layout
    b_ref      : (1, D)       nn.Linear bias
    h_ref      : (1, D)       attention vector h^T
    out_ref    : (TB, D)
    attn_ref   : (TB, L)
    """
    TB, L, D = ctx_ref.shape

    q = q_ref[...]                        # (TB, D)    f32
    ctx = ctx_ref[...]                    # (TB, L, D) f32
    mask_l = mask_l_ref[...]              # (TB, L)
    mask_s = mask_s_ref[...]              # (TB, L, 1)

    # pq[b,l,:] = query[b,:] * context[b,l,:] * mask[b,l]
    pq = (q[:, None, :] * ctx) * mask_s                      # (TB, L, D)

    # Linear layer on the MXU: lin[m,o] = sum_d pq[m,d] * W[o,d] + bias[o]
    # (contraction on weight axis 1 == x @ W.T, no transpose materialized).
    mdt = w_ref.dtype                                        # f32 or bf16
    pq2 = pq.reshape(TB * L, D)                              # layout-preserving
    lin = lax.dot_general(
        pq2.astype(mdt), w_ref[...],
        dimension_numbers=(((1,), (1,)), ((), ())),
        preferred_element_type=jnp.float32) + b_ref[...]     # (TB*L, D) f32

    if activation == 0:
        act = jnp.maximum(lin, 0.0)        # relu    (VPU)
    elif activation == 1:
        act = jax.nn.sigmoid(lin)          # sigmoid (EUP)
    else:
        act = jnp.tanh(lin)                # tanh    (EUP)

    # A[b,l] = (act[b,l,:] . h) * mask[b,l]   -- lane reduction against h^T
    act3 = act.reshape(TB, L, D)                             # layout-preserving
    A = jnp.sum(act3 * h_ref[...], axis=-1) * mask_l         # (TB, L)

    if beta == 1:
        # standard softmax over the item axis
        m = jnp.max(A, axis=-1, keepdims=True)
        e = jnp.exp(A - m)
        attn = e * pl.reciprocal(jnp.sum(e, axis=-1, keepdims=True),
                                 approx=True)
    else:
        # beta-smoothed softmax; rows whose logits sum to zero get zero
        # weights (vectorized form of the torch boolean-indexing branch).
        A_exp = jnp.exp(A) * mask_l                          # (TB, L)
        row_sum_A = jnp.sum(A, axis=-1, keepdims=True)       # (TB, 1)
        denom = jnp.sum(A_exp, axis=-1, keepdims=True)       # (TB, 1)
        denom = jnp.where(denom > 0.0, denom, 1.0)
        if beta == 0.5:
            scale = lax.rsqrt(denom)                         # EUP rsqrt
        else:
            scale = jnp.exp(-beta * jnp.log(denom))          # generic pow
        attn = jnp.where(row_sum_A != 0.0, A_exp * scale, 0.0)

    attn_ref[...] = attn

    # output[b,:] = sum_l attn[b,l] * mask[b,l] * context[b,l,:]
    # Mask folded into the weights; L-reduction on the MXU as a batched
    # (1, L) x (L, D) mat-vec instead of a VPU-multiply + XLU sublane sum.
    attn_m = (attn * mask_l)[:, None, :]                     # (TB, 1, L)
    out3 = jnp.einsum('bql,bld->bqd', attn_m, ctx,
                      preferred_element_type=jnp.float32)    # (TB, 1, D)
    out_ref[...] = out3[:, 0, :]


# ---------------------------------------------------------------------------
# Wrapper
# ---------------------------------------------------------------------------
@functools.partial(jax.jit,
                   static_argnames=("beta", "activation", "block_b",
                                    "use_bf16_matmul"))
def nais_attention(query, context, context_mask, weight, bias, h, *,
                   beta, activation, block_b=8, use_bf16_matmul=False):
    """Pallas forward of NAISAttention.

    query (B, D), context (B, L, D), context_mask (B, L),
    weight (D, D) [torch nn.Linear (out, in) layout], bias (D,), h (D, 1).
    Returns (output (B, D), attention_weight (B, L)).
    """
    B, L, D = context.shape

    # Batch tiling: TB rows per grid step (sublane-aligned); pad B if needed.
    if B <= block_b:
        TB = B
    else:
        TB = block_b
        if TB % 8 != 0:
            raise ValueError("block_b must be a multiple of 8 when B > block_b")
    Bp = ((B + TB - 1) // TB) * TB
    if Bp != B:
        pad = Bp - B
        query = jnp.pad(query, ((0, pad), (0, 0)))
        context = jnp.pad(context, ((0, pad), (0, 0), (0, 0)))
        context_mask = jnp.pad(context_mask, ((0, pad), (0, 0)))

    query = query.astype(jnp.float32)
    context = context.astype(jnp.float32)
    mask_l = context_mask.astype(jnp.float32)                # (Bp, L)
    mask_s = mask_l[:, :, None]                              # (Bp, L, 1)
    w_in = weight.astype(jnp.bfloat16 if use_bf16_matmul else jnp.float32)
    b2 = bias.reshape(1, D).astype(jnp.float32)
    h2 = h.reshape(1, D).astype(jnp.float32)

    grid = (Bp // TB,)
    kernel = functools.partial(_nais_attention_kernel,
                               beta=beta, activation=activation)

    # Advisory cost model: linear matmul + output mat-vec + elementwise + exp.
    flops = 2 * Bp * L * D * D + 2 * Bp * L * D + 8 * Bp * L * D
    transcendentals = Bp * L * D + 3 * Bp * L
    bytes_accessed = (4 * (Bp * D + Bp * L * D + 2 * Bp * L + 2 * D)
                      + int(w_in.dtype.itemsize) * D * D
                      + 4 * (Bp * D + Bp * L))

    out, attn = pl.pallas_call(
        kernel,
        out_shape=(jax.ShapeDtypeStruct((Bp, D), jnp.float32),
                   jax.ShapeDtypeStruct((Bp, L), jnp.float32)),
        grid=grid,
        in_specs=[
            pl.BlockSpec((TB, D), lambda i: (i, 0)),        # query
            pl.BlockSpec((TB, L, D), lambda i: (i, 0, 0)),  # context
            pl.BlockSpec((TB, L), lambda i: (i, 0)),        # mask (lane-major)
            pl.BlockSpec((TB, L, 1), lambda i: (i, 0, 0)),  # mask (sublane-major)
            pl.BlockSpec((D, D), lambda i: (0, 0)),         # weight (resident)
            pl.BlockSpec((1, D), lambda i: (0, 0)),         # bias   (resident)
            pl.BlockSpec((1, D), lambda i: (0, 0)),         # h      (resident)
        ],
        out_specs=(
            pl.BlockSpec((TB, D), lambda i: (i, 0)),        # output
            pl.BlockSpec((TB, L), lambda i: (i, 0)),        # attention_weight
        ),
        compiler_params=pltpu.CompilerParams(
            dimension_semantics=("parallel",),
            vmem_limit_bytes=32 * 1024 * 1024),
        cost_estimate=pl.CostEstimate(
            flops=int(flops),
            transcendentals=int(transcendentals),
            bytes_accessed=int(bytes_accessed)),
    )(query, context, mask_l, mask_s, w_in, b2, h2)

    if Bp != B:
        out = out[:B]
        attn = attn[:B]
    return out, attn


# ---------------------------------------------------------------------------
# Pure-JAX reference mirroring the torch forward (for sanity check)
# ---------------------------------------------------------------------------
def _reference(query, context, context_mask, weight, bias, h, *,
               beta, activation):
    B, L, D = context.shape
    ctx_masked = context * context_mask[:, :, None]
    pq = query[:, None, :] * ctx_masked
    lin = pq.reshape(-1, D) @ weight.T + bias
    if activation == 0:
        act = jnp.maximum(lin, 0.0)
    elif activation == 1:
        act = jax.nn.sigmoid(lin)
    else:
        act = jnp.tanh(lin)
    A = (act @ h).reshape(B, L) * context_mask
    if beta == 1:
        attn = jax.nn.softmax(A, axis=-1)
    else:
        A_exp = jnp.exp(A) * context_mask
        nonzero = (A.sum(1, keepdims=True) != 0.0)
        denom = jnp.where(A_exp.sum(1, keepdims=True) > 0.0,
                          A_exp.sum(1, keepdims=True), 1.0) ** (-beta)
        attn = jnp.where(nonzero, A_exp * denom, 0.0)
    out = jnp.sum(attn[:, :, None] * ctx_masked, axis=1)
    return out, attn


if __name__ == "__main__":
    key = jax.random.PRNGKey(0)
    lambda_ = 0.1

    # (B, L, D, beta, activation, use_bf16_matmul, tol)
    configs = [
        (16, 8, 128, 1.0, 0, False, 5e-3),   # softmax + relu, 2 batch tiles
        (16, 8, 128, 0.5, 2, False, 5e-3),   # rsqrt-smoothed + tanh
        (16, 8, 128, 0.7, 1, False, 5e-3),   # generic beta + sigmoid
        (12, 8, 128, 1.0, 0, False, 5e-3),   # batch-padding path (12 -> 16)
        (16, 8, 128, 1.0, 0, True,  6e-2),   # bf16 MXU path (v6e/v7x)
        (5,  8, 32,  0.5, 2, False, 5e-3),   # small B / small D full-block
    ]

    ok = True
    for idx, (B, L, D, beta, activation, use_bf16, tol) in enumerate(configs):
        k = jax.random.fold_in(key, idx)
        kq, kc, km, kw, kb, kh = jax.random.split(k, 6)
        query = jax.random.normal(kq, (B, D), dtype=jnp.float32)
        context = jax.random.normal(kc, (B, L, D), dtype=jnp.float32)
        context_mask = (jax.random.uniform(km, (B, L)) > 0.3).astype(jnp.float32)
        weight = lambda_ * jax.random.normal(kw, (D, D), dtype=jnp.float32)
        bias = lambda_ * jax.random.normal(kb, (D,), dtype=jnp.float32)
        h = lambda_ * jax.random.normal(kh, (D, 1), dtype=jnp.float32)

        out, attn = nais_attention(query, context, context_mask,
                                   weight, bias, h,
                                   beta=beta, activation=activation,
                                   use_bf16_matmul=use_bf16)
        jax.block_until_ready(out)
        jax.block_until_ready(attn)

        out_ref, attn_ref = _reference(query, context, context_mask,
                                       weight, bias, h,
                                       beta=beta, activation=activation)
        good = (bool(jnp.allclose(out, out_ref, atol=tol, rtol=tol)) and
                bool(jnp.allclose(attn, attn_ref, atol=tol, rtol=tol)))
        if not good:
            print(f"config {idx} mismatch: "
                  f"max out err {float(jnp.max(jnp.abs(out - out_ref))):.3e}, "
                  f"max attn err {float(jnp.max(jnp.abs(attn - attn_ref))):.3e}")
        ok &= good

    if ok:
        print("KERNEL_OK")
    else:
        print("MISMATCH")
</pallas_src>

<mosaic_0001>
module attributes {stable_mosaic.version = 11 : i64} {
  func.func @_nais_attention_kernel(%arg0: i32, %arg1: memref<8x128xf32, #tpu.memory_space<vmem>>, %arg2: memref<8x8x128xf32, #tpu.memory_space<vmem>>, %arg3: memref<8x8xf32, #tpu.memory_space<vmem>>, %arg4: memref<8x8x1xf32, #tpu.memory_space<vmem>>, %arg5: memref<128x128xf32, #tpu.memory_space<vmem>>, %arg6: memref<1x128xf32, #tpu.memory_space<vmem>>, %arg7: memref<1x128xf32, #tpu.memory_space<vmem>>, %arg8: memref<8x128xf32, #tpu.memory_space<vmem>>, %arg9: memref<8x8xf32, #tpu.memory_space<vmem>>) attributes {dimension_semantics = [#tpu.dimension_semantics<parallel>], iteration_bounds = array<i64: 2>, scalar_prefetch = 0 : i64, scratch_operands = 0 : i64, tpu.core_type = #tpu.core_type<tc>, window_params = [{transform_indices = @transform_0, window_bounds = array<i64: 8, 128>}, {transform_indices = @transform_1, window_bounds = array<i64: 8, 8, 128>}, {transform_indices = @transform_2, window_bounds = array<i64: 8, 8>}, {transform_indices = @transform_3, window_bounds = array<i64: 8, 8, 1>}, {pipeline_mode = #tpu.pipeline_mode<synchronous>, transform_indices = @transform_4, window_bounds = array<i64: 128, 128>}, {pipeline_mode = #tpu.pipeline_mode<synchronous>, transform_indices = @transform_5, window_bounds = array<i64: 1, 128>}, {pipeline_mode = #tpu.pipeline_mode<synchronous>, transform_indices = @transform_6, window_bounds = array<i64: 1, 128>}, {transform_indices = @transform_7, window_bounds = array<i64: 8, 128>}, {transform_indices = @transform_8, window_bounds = array<i64: 8, 8>}]} {
    %c0 = arith.constant 0 : index
    %c0_0 = arith.constant 0 : index
    %0 = vector.load %arg1[%c0, %c0_0] : memref<8x128xf32, #tpu.memory_space<vmem>>, vector<8x128xf32>
    %c0_1 = arith.constant 0 : index
    %c0_2 = arith.constant 0 : index
    %c0_3 = arith.constant 0 : index
    %1 = vector.load %arg2[%c0_1, %c0_2, %c0_3] : memref<8x8x128xf32, #tpu.memory_space<vmem>>, vector<8x8x128xf32>
    %c0_4 = arith.constant 0 : index
    %c0_5 = arith.constant 0 : index
    %2 = vector.load %arg3[%c0_4, %c0_5] : memref<8x8xf32, #tpu.memory_space<vmem>>, vector<8x8xf32>
    %c0_6 = arith.constant 0 : index
    %c0_7 = arith.constant 0 : index
    %c0_8 = arith.constant 0 : index
    %3 = vector.load %arg4[%c0_6, %c0_7, %c0_8] : memref<8x8x1xf32, #tpu.memory_space<vmem>>, vector<8x8x1xf32>
    %4 = vector.shape_cast %0 : vector<8x128xf32> to vector<8x1x128xf32>
    %5 = vector.broadcast %4 : vector<8x1x128xf32> to vector<8x8x128xf32>
    %6 = arith.mulf %5, %1 : vector<8x8x128xf32>
    %7 = vector.broadcast %3 : vector<8x8x1xf32> to vector<8x8x128xf32>
    %8 = arith.mulf %6, %7 : vector<8x8x128xf32>
    %9 = vector.shape_cast %8 : vector<8x8x128xf32> to vector<64x128xf32>
    %c0_9 = arith.constant 0 : index
    %c0_10 = arith.constant 0 : index
    %10 = vector.load %arg5[%c0_9, %c0_10] : memref<128x128xf32, #tpu.memory_space<vmem>>, vector<128x128xf32>
    %cst = arith.constant dense<0.000000e+00> : vector<64x128xf32>
    %11 = tpu.matmul %9, %10, %cst {dimension_numbers = #tpu.dot_dimension_numbers<[1], [1], [0], [0], [0, 0, 1, 0], [], []>} : vector<64x128xf32>, vector<128x128xf32>, vector<64x128xf32> -> vector<64x128xf32>
    %c0_11 = arith.constant 0 : index
    %c0_12 = arith.constant 0 : index
    %12 = vector.load %arg6[%c0_11, %c0_12] : memref<1x128xf32, #tpu.memory_space<vmem>>, vector<1x128xf32>
    %13 = vector.broadcast %12 : vector<1x128xf32> to vector<64x128xf32>
    %14 = arith.addf %11, %13 : vector<64x128xf32>
    %cst_13 = arith.constant 0.000000e+00 : f32
    %15 = vector.broadcast %cst_13 : f32 to vector<64x128xf32>
    %16 = arith.maximumf %14, %15 : vector<64x128xf32>
    %17 = vector.shape_cast %16 : vector<64x128xf32> to vector<8x8x128xf32>
    %c0_14 = arith.constant 0 : index
    %c0_15 = arith.constant 0 : index
    %18 = vector.load %arg7[%c0_14, %c0_15] : memref<1x128xf32, #tpu.memory_space<vmem>>, vector<1x128xf32>
    %19 = vector.shape_cast %18 : vector<1x128xf32> to vector<1x1x128xf32>
    %20 = vector.broadcast %19 : vector<1x1x128xf32> to vector<8x8x128xf32>
    %21 = arith.mulf %17, %20 : vector<8x8x128xf32>
    %cst_16 = arith.constant dense<0.000000e+00> : vector<8x8xf32>
    %22 = vector.multi_reduction <add>, %21, %cst_16 [2] : vector<8x8x128xf32> to vector<8x8xf32>
    %23 = arith.mulf %22, %2 : vector<8x8xf32>
    %cst_17 = arith.constant dense<0xFF800000> : vector<8xf32>
    %24 = vector.multi_reduction <maximumf>, %23, %cst_17 [1] : vector<8x8xf32> to vector<8xf32>
    %25 = vector.shape_cast %24 : vector<8xf32> to vector<8x1xf32>
    %26 = vector.broadcast %25 : vector<8x1xf32> to vector<8x8xf32>
    %27 = arith.subf %23, %26 : vector<8x8xf32>
    %28 = math.exp %27 : vector<8x8xf32>
    %cst_18 = arith.constant dense<0.000000e+00> : vector<8xf32>
    %29 = vector.multi_reduction <add>, %28, %cst_18 [1] : vector<8x8xf32> to vector<8xf32>
    %30 = vector.shape_cast %29 : vector<8xf32> to vector<8x1xf32>
    %31 = tpu.reciprocal %30 {approx = true} : vector<8x1xf32> -> vector<8x1xf32>
    %32 = vector.broadcast %31 : vector<8x1xf32> to vector<8x8xf32>
    %33 = arith.mulf %28, %32 : vector<8x8xf32>
    %c0_19 = arith.constant 0 : index
    %c0_20 = arith.constant 0 : index
    %34 = vector.load %arg9[%c0_19, %c0_20] : memref<8x8xf32, #tpu.memory_space<vmem>>, vector<8x8xf32>
    tpu.vector_store %arg9[%c0_19, %c0_20], %33 {strides = array<i32>} : memref<8x8xf32, #tpu.memory_space<vmem>>, vector<8x8xf32>,
    %35 = arith.mulf %33, %2 : vector<8x8xf32>
    %36 = vector.shape_cast %35 : vector<8x8xf32> to vector<8x1x8xf32>
    "tpu.trace_start"() <{level = 10 : i32, message = "bql,bld->bqd"}> : () -> ()
    %cst_21 = arith.constant dense<0.000000e+00> : vector<8x1x128xf32>
    %37 = tpu.matmul %36, %1, %cst_21 {dimension_numbers = #tpu.dot_dimension_numbers<[2], [1], [1], [2], [0, 0, 0, 1, 1, 2], [0], [0]>} : vector<8x1x8xf32>, vector<8x8x128xf32>, vector<8x1x128xf32> -> vector<8x1x128xf32>
    "tpu.trace_stop"() : () -> ()
    %38 = vector.shape_cast %37 : vector<8x1x128xf32> to vector<8x128xf32>
    %c0_22 = arith.constant 0 : index
    %c0_23 = arith.constant 0 : index
    %39 = vector.load %arg8[%c0_22, %c0_23] : memref<8x128xf32, #tpu.memory_space<vmem>>, vector<8x128xf32>
    tpu.vector_store %arg8[%c0_22, %c0_23], %38 {strides = array<i32>} : memref<8x128xf32, #tpu.memory_space<vmem>>, vector<8x128xf32>,
    return
  }
  func.func @transform_0(%arg0: i32) -> (i32, i32) {
    %c0_i32 = arith.constant 0 : i32
    %c0_i32_0 = arith.constant 0 : i32
    return %arg0, %c0_i32 : i32, i32
  }
  func.func @transform_1(%arg0: i32) -> (i32, i32, i32) {
    %c0_i32 = arith.constant 0 : i32
    %c0_i32_0 = arith.constant 0 : i32
    %c0_i32_1 = arith.constant 0 : i32
    return %arg0, %c0_i32, %c0_i32_0 : i32, i32, i32
  }
  func.func @transform_2(%arg0: i32) -> (i32, i32) {
    %c0_i32 = arith.constant 0 : i32
    %c0_i32_0 = arith.constant 0 : i32
    return %arg0, %c0_i32 : i32, i32
  }
  func.func @transform_3(%arg0: i32) -> (i32, i32, i32) {
    %c0_i32 = arith.constant 0 : i32
    %c0_i32_0 = arith.constant 0 : i32
    %c0_i32_1 = arith.constant 0 : i32
    return %arg0, %c0_i32, %c0_i32_0 : i32, i32, i32
  }
  func.func @transform_4(%arg0: i32) -> (i32, i32) {
    %c0_i32 = arith.constant 0 : i32
    %c0_i32_0 = arith.constant 0 : i32
    %c0_i32_1 = arith.constant 0 : i32
    return %c0_i32, %c0_i32_0 : i32, i32
  }
  func.func @transform_5(%arg0: i32) -> (i32, i32) {
    %c0_i32 = arith.constant 0 : i32
    %c0_i32_0 = arith.constant 0 : i32
    %c0_i32_1 = arith.constant 0 : i32
    return %c0_i32, %c0_i32_0 : i32, i32
  }
  func.func @transform_6(%arg0: i32) -> (i32, i32) {
    %c0_i32 = arith.constant 0 : i32
    %c0_i32_0 = arith.constant 0 : i32
    %c0_i32_1 = arith.constant 0 : i32
    return %c0_i32, %c0_i32_0 : i32, i32
  }
  func.func @transform_7(%arg0: i32) -> (i32, i32) {
    %c0_i32 = arith.constant 0 : i32
    %c0_i32_0 = arith.constant 0 : i32
    return %arg0, %c0_i32 : i32, i32
  }
  func.func @transform_8(%arg0: i32) -> (i32, i32) {
    %c0_i32 = arith.constant 0 : i32
    %c0_i32_0 = arith.constant 0 : i32
    return %arg0, %c0_i32 : i32, i32
  }
}

</mosaic_0001>

<bundles_post_ra>
// kernel: nais_attention.1
= control target key start
LH: loop header
LB: loop body
LE: loop exit
PB: predicated region body
PF: predicated region fallthrough
CT: control target
= control target key end

     0   :  { %14 = vsyncpa [#allocation3], 0  ;;  %s2755_s0 = inlined_call_operand.vmem [shape: f32[16,128], index: 0, kind: input, shape index: {}]   ;;  %s2756_s1 = inlined_call_operand.vmem [shape: f32[16,8,128], index: 1, kind: input, shape index: {}]   ;;  %s2757_s2 = inlined_call_operand.vmem [shape: f32[16,8], index: 2, kind: input, shape index: {}]   ;;  %s2758_s3 = inlined_call_operand.vmem [shape: f32[16,8,1], index: 3, kind: input, shape index: {}]   ;;  %s2759_s4 = inlined_call_operand.hbm [shape: f32[128,128], index: 4, kind: input, shape index: {}]   ;;  %s2760_s5 = inlined_call_operand.vmem [shape: f32[1,128], index: 5, kind: input, shape index: {}]   ;;  %s2761_s6 = inlined_call_operand.vmem [shape: f32[1,128], index: 6, kind: input, shape index: {}]   ;;  %s2762_s7 = inlined_call_operand.hbm [shape: f32[16,128], index: 7, kind: output, shape index: {0}]   ;;  %s2763_s8 = inlined_call_operand.vmem [shape: f32[16,8], index: 8, kind: output, shape index: {1}]  }
   0x1   :  { %15 = vsyncpa [#allocation4], 0 }
   0x2   :  { %17 = vsyncpa [#allocation4 + $0x1], 0  ;;  %s2338_s27 = smov 0   ;;  %s2340_s28 = smov 0  }
   0x3   :  { %s2342_s29 = smov 0   ;;  %s2344_s30 = smov 0  }
   0x4 LB: > { %s2359_s9 = sadd.s32 4294967295, %s2283_s30   ;;  %s1964_s10 = sadd.s32 4294967294, %s2283_s30   ;;  %s2283_s30 = sphi %s2344_s30, %s2771_s30   ;;  %s2279_s29 = sphi %s2342_s29, %s2770_s29   ;;  %s2275_s28 = sphi %s2340_s28, %s2769_s28   ;;  %s2271_s27 = sphi %s2338_s27, %s2768_s27  }
   0x5   : > { %s2363_s11 = sadd.s32 1, %s2283_s30   ;;  %s197_s12 = sadd.s32 1, %s2279_s29 }
   0x6   : > { %s194_s13 = ssub.s32 %s2283_s30, %s2363_s11  ;;  %p207_p0 = scmp.ne.s32.totalorder %s2279_s29, %s2275_s28 }
   0x7   : > { %p195_p1 = scmp.eq.s32.totalorder %s194_s13, 0  ;;  %p208_p2 = scmp.eq.s32.totalorder %s2359_s9, 1 }
   0x8   : > { %p213_p3 = scmp.ne.s32.totalorder %s2275_s28, %s2271_s27  ;;  %p214_p4 = scmp.eq.s32.totalorder %s1964_s10, 1 }
   0x9   : > { %s2374_s14 = scalar_select %p195_p1, %s2279_s29, %s197_s12  }
   0xa   : > { %p2376_p5 = por %p208_p2, %p207_p0  ;;  %p2380_p6 = por %p214_p4, %p213_p3 }
   0xb   : > { %p1965_p7 = scmp.ge.s32.totalorder %s2283_s30, 1  ;;  %p247_p8 = scmp.lt.s32.totalorder %s2283_s30, 3 }
   0xc   : > { %s2765_s16 = scalar_select %p2380_p6, 1, 0 }
   0xd   : > { %p2130_p9 = scmp.eq.s32.totalorder %s2359_s9, 0  ;;  %p2387_p10 = pnand %p1965_p7, %p247_p8 }
   0xe   : > { %s2285_s18 = smov [#allocation2]  }
   0xf   : > { %s259_s19 = sshll.u32 %s2285_s18, 4  ;;  %p2122_p11 = pneg %p2387_p10  ;;  %s260_s19 = int_to_ptr.vmem [resolvable:$true] %s259_s19 }
  0x10   : > { %s2204_s20 = scalar_lea.vmem %s260_s19, 2048  ;;  %p2212_p3 = scmp.lt.s32.totalorder %s260_s19, %s260_s19 }
  0x11   : > { %p2123_p12 = pnand %p2130_p9, %p2122_p11  ;;  %p2205_p0 = scmp.ne.s32.totalorder %s260_s19, %s2204_s20 }
  0x12   : > { %p2213_p4 = scmp.lt.s32.totalorder %s2204_s20, %s2204_s20 }
  0x13   : > { %p2195_p13 = pneg %p2123_p12 }
  0x14   : > { %p2214_p6 = por %p2213_p4, %p2212_p3 }
  0x15   : > { %p2207_p1 = pnand %p2205_p0, %p2195_p13 }
  0x17   : > { %p2208_p2 = pneg %p2207_p1 }
  0x19   : > { %p2215_p7 = pnand %p2214_p6, %p2208_p2 }
  0x1b   : > { %2218 = shalt.err (!%p2215_p7)
}
  0x1c   : > { %s2286_s21 = smov 128   ;;  %s2287_s22 = smov 8  }
  0x1d   : > { %2125 = dma.hbm_to_vmem [thread:$0]  (!%p2123_p12), %s2759_s4, 2048, %s260_s19, [#allocation3], %s2286_s21, %s2286_s21, %s2287_s22  }
  0x1e   : > { %313 = sbr.rel (%p2387_p10) target bundleno = 1498 (0x5da), region = 48 }
  0x23   : > { %2262 = dma.done.wait (%p2130_p9), [#allocation3], 2048  }
  0x24   : > { %2264 = vsyncadd (%p2130_p9), [#allocation3], 4294965248  ;;  %s1972_s25 = sshll.u32 %s2359_s9, 3  ;;  %v2288_v0 = vmov 0   ;;  %v567_v5 = vld [vmem:[#allocation2 + $0x78] sm:$0xff]  ;;  %v566_v6 = vld [vmem:[#allocation2 + $0x70] sm:$0xff]  ;;  %v411_v10 = vlaneseq }
  0x25   : > { %2173 = vset.pattern.permute.xlu1 %v2288_v0  ;;  %2172 = vset.pattern.permute.xlu0 %v2288_v0  ;;  %p369_p6 = scmp.lt.s32.totalorder %s1972_s25, 15  ;;  %p364_p8 = scmp.lt.s32.totalorder %s2359_s9, 1  ;;  %v565_v9 = vld [vmem:[#allocation2 + $0x68] sm:$0xff]  ;;  %v564_v13 = vld [vmem:[#allocation2 + $0x60] sm:$0xff]  ;;  %v563_v15 = vld [vmem:[#allocation2 + $0x58] sm:$0xff]  ;;  %vm858_vm0 = vcmask 1041409  }
  0x26   : > { %2032 = vmatprep.subr.mxu0 %v567_v5  ;;  %v2422_v14 = vshrl.u32 %v411_v10, 7  ;;  %v562_v20 = vld [vmem:[#allocation2 + $0x50] sm:$0xff]  ;;  %v561_v26 = vld [vmem:[#allocation2 + $0x48] sm:$0xff]  ;;  %v560_v30 = vld [vmem:[#allocation2 + $0x40] sm:$0xff]  ;;  %v2289_v40 = vmov 1966171168  }
  0x27   : > { %s2773_s25 = smov (!%p369_p6, %s1972_s25), 15  ;;  %2033 = vmatpush3.xpose.msra.mxu0 %v567_v5  ;;  %v559_v32 = vld [vmem:[#allocation2 + $0x38] sm:$0xff]  ;;  %v558_v33 = vld [vmem:[#allocation2 + $0x30] sm:$0xff]  ;;  %v557_v34 = vld [vmem:[#allocation2 + $0x28] sm:$0xff]  ;;  %v409_v41 = vunpack.c.l.s4 %v2289_v40  ;;  %vm860_vm1 = vcmask 1042434   ;;  %vm862_vm2 = vcmask 1043459  }
  0x28   : > { %s1973_s26 = sshll.u32 %s2773_s25, 3  ;;  %2034 = vmatprep.subr.mxu0 %v566_v6  ;;  %v2425_v16 = vsub.s32 0, %v2422_v14  ;;  %v2430_v18 = vsub.s32 2, %v2422_v14  ;;  %v2437_v22 = vsub.s32 3, %v2422_v14  ;;  %v2440_v23 = vsub.s32 1, %v2422_v14  ;;  %v556_v35 = vld [vmem:[#allocation2 + $0x20] sm:$0xff] }
  0x29   : > { %s382_s13 = scalar_lea.vmem %s2758_s3, %s1973_s26  ;;  %v2443_v24 = vsub.s32 4, %v2422_v14  ;;  %v2450_v28 = vsub.s32 5, %v2422_v14  ;;  %v555_v36 = vld [vmem:[#allocation2 + $0x18] sm:$0xff]  ;;  %v554_v37 = vld [vmem:[#allocation2 + $0x10] sm:$0xff]  ;;  %v553_v38 = vld [vmem:[#allocation2 + $0x8] sm:$0xff]  ;;  %v410_v42 = vunpack.c.0.s8 %v409_v41  ;;  %vm864_vm3 = vcmask 1044484  }
  0x2a   : > { %v400_v1 = vld [vmem:[%s382_s13 + $0x10] sm:$0xff]  ;;  %v398_v2 = vld [vmem:[%s382_s13] sm:$0xff]  ;;  %v401_v3 = vld [vmem:[%s382_s13 + $0x18] sm:$0xff]  ;;  %s365_s17 = scalar_select %p364_p8, %s2359_s9, 1  ;;  %vm866_vm4 = vcmask 1045509   ;;  %vm868_vm5 = vcmask 1046534  }
  0x2b   : > { %516 = vperm.xlu1 %2173, %v400_v1   ;;  %506 = vperm.xlu0 %2172, %v398_v2   ;;  %v399_v4 = vld [vmem:[%s382_s13 + $0x8] sm:$0xff]  ;;  %v402_v8 = vld [vmem:[%s382_s13 + $0x20] sm:$0xff]  ;;  %v405_v11 = vld [vmem:[%s382_s13 + $0x38] sm:$0xff]  ;;  %v413_v43 = vsub.s32 %v410_v42, %v2422_v14  ;;  %vm870_vm6 = vcmask 1047559   ;;  %vm873_vm7 = vcmask 64512   ;;  %vm2291_vm8 = vmmov 0  }
  0x2c   : > { %v403_v7 = vld [vmem:[%s382_s13 + $0x28] sm:$0xff]  ;;  %2035 = vmatpush3.xpose.msra.mxu0 %v566_v6  ;;  %v404_v12 = vld [vmem:[%s382_s13 + $0x30] sm:$0xff]  ;;  %s2415_s18 = sshll.u32 %s365_s17, 3  ;;  %v552_v39 = vld [vmem:[#allocation2] sm:$0xff]  ;;  %s2466_s13 = scalar_lea.vmem %s2756_s1, %s1973_s26 }
  0x2d   : > { %2036 = vmatprep.subr.mxu0 %v565_v9  ;;  %s377_s21 = scalar_lea.vmem %s2757_s2, %s2415_s18  ;;  %s367_s24 = scalar_lea.vmem %s2755_s0, %s2415_s18  ;;  %v2470_v53 = vld [vmem:[%s2466_s13] sm:$0xff]  ;;  %v2474_v57 = vld [vmem:[%s2466_s13 + $0x10] sm:$0xff]  ;;  %v2479_v61 = vld [vmem:[%s2466_s13 + $0x8] sm:$0xff] }
  0x2e   : > { %v2427_v17 = vld [vmem:[%s377_s21] sm:$0xff]  ;;  %s387_s22 = scalar_lea.vmem %s2763_s8, %s2415_s18  ;;  %s355_s18 = sand.u32 1, %s2275_s28  }
  0x2f   : > { %521 = vperm.xlu1 %2173, %v401_v3   ;;  %511 = vperm.xlu0 %2172, %v399_v4   ;;  %v723_v19 = vrot.slane %v2427_v17, %v2425_v16  ;;  %v737_v21 = vrot.slane %v2427_v17, %v2430_v18  ;;  %v730_v25 = vrot.slane %v2427_v17, %v2440_v23  ;;  %v388_v44 = vld [vmem:[%s367_s24] sm:$0xff]  ;;  %s1970_s23 = sshll.u32 %s355_s18, 3  ;;  %s1989_s24 = sshll.u32 %s2359_s9, 7 }
  0x30   : > { %2037 = vmatpush3.xpose.msra.mxu0 %v565_v9  ;;  %v744_v27 = vrot.slane %v2427_v17, %v2437_v22  ;;  %v751_v29 = vrot.slane %v2427_v17, %v2443_v24  ;;  %v758_v31 = vrot.slane %v2427_v17, %v2450_v28  ;;  %v414_v45 = vrot.slane %v388_v44, %v413_v43  ;;  %v2486_v6 = vld [vmem:[%s2466_s13 + $0x20] sm:$0xff]  ;;  %s357_s10 = scalar_lea.vmem [#allocation5], %s1970_s23  ;;  %s2719_s26 = scalar_lea.hbm %s2762_s7, %s1989_s24 }
  0x31   : > { %2038 = vmatprep.subr.mxu0 %v564_v13  ;;  %v407_v46 = vcombine.high %v388_v44, %v388_v44  ;;  %s1830_s12 = sshll.u32 %s357_s10, 4  ;;  %s1813_s9 = scalar_lea.sflag [#allocation4], %s355_s18  ;;  %s1831_s12 = int_to_ptr.vmem [resolvable:$true] %s1830_s12 }
  0x32   : > { %v430_v47 = vrot.slane %v414_v45, %v413_v43  ;;  %v422_v48 = vcombine.high %v414_v45, %v414_v45  ;;  %s2219_s17 = scalar_lea.vmem %s1831_s12, 128  ;;  %s2292_s19 = smov [#allocation5]  }
  0x33   : > { %531 = vperm.xlu1 %2173, %v403_v7   ;;  %526 = vperm.xlu0 %2172, %v402_v8   ;;  %v421_v50 = vrot.slane %v407_v46, %v413_v43  ;;  %v2489_v8 = vld [vmem:[%s2466_s13 + $0x18] sm:$0xff]  ;;  %p2220_p9 = scmp.ne.s32.totalorder %s1831_s12, %s2219_s17  ;;  %s2223_s20 = sshll.u32 %s2292_s19, 4  ;;  %s2224_s20 = int_to_ptr.vmem [resolvable:$false] %s2223_s20 }
  0x34   : > { %2039 = vmatpush3.xpose.msra.mxu0 %v564_v13  ;;  %v452_v49 = vcombine.high %v430_v47, %v430_v47  ;;  %v459_v51 = vrot.slane %v430_v47, %v2425_v16  ;;  %v444_v52 = vrot.slane %v422_v48, %v413_v43  ;;  %v1979_v47 = vld [vmem:[%s2761_s6] ss:$0 sm:$0xff]  ;;  %s2225_s21 = scalar_lea.vmem %s2224_s20, 256  ;;  %p2226_p12 = scmp.lt.s32.totalorder %s1831_s12, %s2224_s20 }
  0x35   : > { %2040 = vmatprep.subr.mxu0 %v563_v15  ;;  %v423_v55 = vcombine.high %v421_v50, %v421_v50  ;;  %v437_v56 = vrot.slane %v421_v50, %v413_v43  ;;  %p2221_p10 = pnand %p2220_p9, %p2376_p5  ;;  %p2227_p13 = scmp.lt.s32.totalorder %s2225_s21, %s2219_s17 }
  0x36   : > { %v467_v54 = vrot.slane %v452_v49, %v2425_v16  ;;  %v496_v58 = vmul.f32 %v459_v51, %v2470_v53  ;;  %v454_v59 = vcombine.high %v444_v52, %v444_v52  ;;  %v463_v60 = vrot.slane %v444_v52, %v2425_v16 }
  0x37   : > { %541 = vperm.xlu1 %2173, %v405_v11   ;;  %536 = vperm.xlu0 %2172, %v404_v12   ;;  %v451_v1 = vrot.slane %v423_v55, %v413_v43  ;;  %v475_v2 = vrot.slane %v437_v56, %v2425_v16  ;;  %v453_v7 = vcombine.high %v437_v56, %v437_v56  ;;  %v1978_v43 = vld [vmem:[%s2760_s5] ss:$0 sm:$0xff]  ;;  %p2222_p11 = pneg %p2221_p10  ;;  %p2228_p0 = por %p2227_p13, %p2226_p12 }
  0x38   : > { %2041 = vmatpush3.xpose.msra.mxu0 %v563_v15  ;;  %v498_v63 = vmul.f32 %v467_v54, %v2474_v57  ;;  %v471_v4 = vrot.slane %v454_v59, %v2425_v16  ;;  %v497_v5 = vmul.f32 %v463_v60, %v2479_v61 }
  0x39   : > { %2042 = vmatprep.subr.mxu0 %v562_v20  ;;  %v479_v13 = vrot.slane %v451_v1, %v2425_v16  ;;  %v500_v15 = vmul.f32 %v475_v2, %v2486_v6  ;;  %p2229_p1 = pnand %p2228_p0, %p2222_p11 }
  0x3b   : > { %725 = vbcast.lane.b32.xlu1 %v723_v19, 256  ;;  %732 = vbcast.lane.b32.xlu0 %v730_v25, 256  ;;  %v499_v19 = vmul.f32 %v471_v4, %v2489_v8  ;;  %v455_v25 = vcombine.high %v451_v1, %v451_v1 }
  0x3c   : > { %2043 = vmatpush3.xpose.msra.mxu0 %v562_v20 }
  0x3d   : > { %2044 = vmatprep.subr.mxu0 %v561_v26 }
  0x3f   : > { %739 = vbcast.lane.b32.xlu1 %v737_v21, 256  ;;  %753 = vbcast.lane.b32.xlu0 %v751_v29, 256  ;;  %v2495_v21 = vld [vmem:[%s2466_s13 + $0x28] sm:$0xff] }
  0x40   : > { %2045 = vmatpush3.xpose.msra.mxu0 %v561_v26  ;;  %v483_v26 = vrot.slane %v453_v7, %v2425_v16 }
  0x41   : > { %2046 = vmatprep.subr.mxu0 %v560_v30 }
  0x43   : > { %746 = vbcast.lane.b32.xlu1 %v744_v27, 256  ;;  %v2499_v27 = vld [vmem:[%s2466_s13 + $0x30] sm:$0xff] }
  0x44   : > { %2047 = vmatpush3.xpose.msra.mxu0 %v560_v30  ;;  %v501_v30 = vmul.f32 %v479_v13, %v2495_v21 }
  0x45   : > { %2048 = vmatprep.subr.mxu0 %v559_v32 }
  0x47   : > { %760 = vbcast.lane.b32.xlu1 %v758_v31, 256 }
  0x48   : > { %2049 = vmatpush3.xpose.msra.mxu0 %v559_v32 }
  0x49   : > { %2050 = vmatprep.subr.mxu0 %v558_v33 }
  0x4c   : > { %2051 = vmatpush3.xpose.msra.mxu0 %v558_v33 }
  0x4d   : > { %2052 = vmatprep.subr.mxu0 %v557_v34 }
  0x50   : > { %2053 = vmatpush3.xpose.msra.mxu0 %v557_v34  ;;  %v487_v34 = vrot.slane %v455_v25, %v2425_v16 }
  0x51   : > { %2054 = vmatprep.subr.mxu0 %v556_v35 }
  0x54   : > { %2055 = vmatpush3.xpose.msra.mxu0 %v556_v35  ;;  %v502_v35 = vmul.f32 %v483_v26, %v2499_v27 }
  0x55   : > { %2056 = vmatprep.subr.mxu0 %v555_v36 }
  0x58   : > { %2057 = vmatpush3.xpose.msra.mxu0 %v555_v36  ;;  %v2505_v36 = vld [vmem:[%s2466_s13 + $0x38] sm:$0xff] }
  0x59   : > { %2058 = vmatprep.subr.mxu0 %v554_v37 }
  0x5c   : > { %2059 = vmatpush3.xpose.msra.mxu0 %v554_v37 }
  0x5d   : > { %2060 = vmatprep.subr.mxu0 %v553_v38 }
  0x60   : > { %2061 = vmatpush3.xpose.msra.mxu0 %v553_v38 }
  0x61   : > { %2062 = vmatprep.subr.mxu0 %v552_v39 }
  0x64   : > { %2063 = vmatpush3.xpose.msra.mxu0 %v552_v39  ;;  %v503_v39 = vmul.f32 %v487_v34, %v2505_v36 }
  0xa6   : > { %v517_v62 = vpop.permute.xlu1 %516  ;;  %v507_v0 = vpop.permute.xlu0 %506 }
  0xa7   : > { %v544_v3 = vmul.f32 %v507_v0, %v496_v58  ;;  %v546_v9 = vmul.f32 %v517_v62, %v498_v63 }
  0xa9   : > { %2064 = vmatprep.mubr.f32.mxu0 %v544_v3 }
  0xaa   : > { %v522_v11 = vpop.permute.xlu1 %521  ;;  %v512_v12 = vpop.permute.xlu0 %511 }
  0xab   : > { %v545_v20 = vmul.f32 %v512_v12, %v497_v5  ;;  %v547_v32 = vmul.f32 %v522_v11, %v499_v19 }
  0xad   : > { %2065 = vmatmul.mubr.f32.vlgmr.msra.gmra.mxu0 %v545_v20 }
  0xae   : > { %v532_v29 = vpop.permute.xlu1 %531  ;;  %v527_v31 = vpop.permute.xlu0 %526  ;;  %2067 = vmatprep.mubr.f32.mxu0 %v546_v9 }
  0xaf   : > { %v548_v33 = vmul.f32 %v527_v31, %v500_v15  ;;  %v549_v38 = vmul.f32 %v532_v29, %v501_v30  ;;  %v2515_v29 = vsub.s32 7, %v2422_v14  ;;  %v2520_v31 = vsub.s32 6, %v2422_v14 }
  0xb1   : > { %2068 = vmatmul.mubr.f32.gmra.mxu0 %v547_v32  ;;  %v772_v30 = vrot.slane %v2427_v17, %v2515_v29  ;;  %v765_v32 = vrot.slane %v2427_v17, %v2520_v31 }
  0xb2   : > { %v537_v37 = vpop.permute.xlu0 %536  ;;  %2070 = vmatprep.mubr.f32.mxu0 %v548_v33  ;;  %v542_v41 = vpop.permute.xlu1 %541 }
  0xb3   : > { %v550_v40 = vmul.f32 %v537_v37, %v502_v35  ;;  %v551_v42 = vmul.f32 %v542_v41, %v503_v39 }
  0xb5   : > { %2071 = vmatmul.mubr.f32.gmra.mxu0 %v549_v38 }
  0xb6   : > { %2073 = vmatprep.mubr.f32.mxu0 %v550_v40  ;;  %v2524_v33 = vpop.permute.xlu1 %725  ;;  %v2530_v37 = vpop.permute.xlu0 %732 }
  0xb9   : > { %2074 = vmatmul.mubr.f32.gmra.mxu0 %v551_v42 }
  0xba   : > { %v2526_v34 = vpop.permute.xlu1 %739  ;;  %v2534_v39 = vpop.permute.xlu0 %753 }
  0xbe   : > { %v2528_v35 = vpop.permute.xlu1 %746 }
  0xc2   : > { %v2532_v38 = vpop.permute.xlu1 %760 }
 0x16d   : > { %v2066_v44 = vpop.f32.mrf.mxu0 }
 0x16e   : > { %v647_v45 = vadd.f32 %v2066_v44, %v1978_v43 }
 0x16f   : > { %v641_v46 = vpop.f32.mrf.mxu0 }
 0x170   : > { %v681_v48 = vmax.f32 %v647_v45, 0.0  ;;  %v642_v49 = vadd.f32 %v1978_v43, %v641_v46 }
 0x171   : > { %v2069_v50 = vpop.f32.mrf.mxu0 }
 0x172   : > { %v680_v51 = vmax.f32 %v642_v49, 0.0  ;;  %v657_v52 = vadd.f32 %v2069_v50, %v1978_v43  ;;  %v696_v54 = vmul.f32 %v1979_v47, %v681_v48 }
 0x173   : > { %v651_v55 = vpop.f32.mrf.mxu0 }
 0x174   : > { %v683_v56 = vmax.f32 %v657_v52, 0.0  ;;  %v652_v58 = vadd.f32 %v1978_v43, %v651_v55  ;;  %705 = vadd.xlane.f32.xlu1 %v696_v54  ;;  %v695_v59 = vmul.f32 %v1979_v47, %v680_v51 }
 0x175   : > { %v2072_v60 = vpop.f32.mrf.mxu0 }
 0x176   : > { %703 = vadd.xlane.f32.xlu0 %v695_v59  ;;  %v667_v62 = vadd.f32 %v2072_v60, %v1978_v43  ;;  %v682_v0 = vmax.f32 %v652_v58, 0.0  ;;  %v698_v2 = vmul.f32 %v1979_v47, %v683_v56  ;;  %v825_v59 = vand.u32 127, %v411_v10 }
 0x177   : > { %v661_v63 = vpop.f32.mrf.mxu0 }
 0x178   : > { %v662_v1 = vadd.f32 %v1978_v43, %v661_v63  ;;  %v685_v5 = vmax.f32 %v667_v62, 0.0  ;;  %v697_v12 = vmul.f32 %v1979_v47, %v682_v0  ;;  %v2565_v63 = vsub.s32 %v825_v59, %v2422_v14 }
 0x179   : > { %v2075_v3 = vpop.f32.mrf.mxu0 }
 0x17a   : > { %v684_v4 = vmax.f32 %v662_v1, 0.0  ;;  %709 = vadd.xlane.f32.xlu0 %v698_v2  ;;  %v677_v9 = vadd.f32 %v2075_v3, %v1978_v43  ;;  %v700_v20 = vmul.f32 %v1979_v47, %v685_v5 }
 0x17b   : > { %v671_v7 = vpop.f32.mrf.mxu0 }
 0x17c   : > { %v672_v11 = vadd.f32 %v1978_v43, %v671_v7  ;;  %v699_v13 = vmul.f32 %v1979_v47, %v684_v4  ;;  %v687_v19 = vmax.f32 %v677_v9, 0.0 }
 0x17e   : > { %v686_v15 = vmax.f32 %v672_v11, 0.0  ;;  %707 = vadd.xlane.f32.xlu0 %v697_v12  ;;  %711 = vadd.xlane.f32.xlu1 %v699_v13  ;;  %v702_v26 = vmul.f32 %v1979_v47, %v687_v19 }
 0x180   : > { %v701_v25 = vmul.f32 %v1979_v47, %v686_v15 }
 0x182   : > { %713 = vadd.xlane.f32.xlu0 %v700_v20  ;;  %715 = vadd.xlane.f32.xlu1 %v701_v25 }
 0x186   : > { %717 = vadd.xlane.f32.xlu0 %v702_v26 }
 0x193   : > { %774 = vbcast.lane.b32.xlu1 %v772_v30, 256 }
 0x19c   : > { %767 = vbcast.lane.b32.xlu0 %v765_v32, 256 }
 0x1fd   : > { %v706_v40 = vpop.xlane.xlu1 %705 }
 0x1fe   : > { %v2537_v41 = vmul.f32 %v2530_v37, %v706_v40 }
 0x1ff   : > { %v704_v42 = vpop.xlane.xlu0 %703 }
 0x200   : > { %v784_v17 = vmul.f32 %v2524_v33, %v704_v42  ;;  %804 = vperm.xlu1 %2173, %v2537_v41  }
 0x202   : > { %801 = vperm.xlu0 %2172, %v784_v17  }
 0x203   : > { %v710_v43 = vpop.xlane.xlu0 %709 }
 0x204   : > { %v2542_v44 = vmul.f32 %v2528_v35, %v710_v43 }
 0x206   : > { %810 = vperm.xlu1 %2173, %v2542_v44  }
 0x207   : > { %v708_v45 = vpop.xlane.xlu0 %707  ;;  %v712_v46 = vpop.xlane.xlu1 %711 }
 0x208   : > { %v786_v47 = vmul.f32 %v2526_v34, %v708_v45  ;;  %v788_v50 = vmul.f32 %v2534_v39, %v712_v46 }
 0x20a   : > { %807 = vperm.xlu0 %2172, %v786_v47  }
 0x20b   : > { %v714_v48 = vpop.xlane.xlu0 %713  ;;  %v716_v49 = vpop.xlane.xlu1 %715 }
 0x20c   : > { %v2548_v51 = vmul.f32 %v2532_v38, %v714_v48 }
 0x20e   : > { %813 = vperm.xlu0 %2172, %v788_v50   ;;  %816 = vperm.xlu1 %2173, %v2548_v51  }
 0x20f   : > { %v718_v52 = vpop.xlane.xlu0 %717  ;;  %v2551_v54 = vpop.permute.xlu1 %774 }
 0x210   : > { %v2554_v55 = vmul.f32 %v2551_v54, %v718_v52 }
 0x212   : > { %822 = vperm.xlu1 %2173, %v2554_v55  }
 0x213   : > { %v2557_v56 = vpop.permute.xlu0 %767 }
 0x214   : > { %v2560_v58 = vmul.f32 %v2557_v56, %v716_v49 }
 0x216   : > { %819 = vperm.xlu0 %2172, %v2560_v58  }
 0x27b   : > { %v805_v62 = vpop.permute.xlu1 %804 }
 0x27c   : > { %v833_v4 = vrot.slane %v805_v62, %v2565_v63 }
 0x27d   : > { %v802_v60 = vpop.permute.xlu0 %801 }
 0x27e   : > { %v829_v2 = vrot.slane %v802_v60, %v2565_v63 }
 0x280   : > { %v859_v9 = vsel %vm858_vm0, %v833_v4, %v829_v2 }
 0x281   : > { %v811_v1 = vpop.permute.xlu1 %810 }
 0x282   : > { %v841_v11 = vrot.slane %v811_v1, %v2565_v63 }
 0x285   : > { %v808_v0 = vpop.permute.xlu0 %807 }
 0x286   : > { %v837_v3 = vrot.slane %v808_v0, %v2565_v63 }
 0x288   : > { %v861_v10 = vsel %vm860_vm1, %v837_v3, %v859_v9 }
 0x289   : > { %v814_v5 = vpop.permute.xlu0 %813  ;;  %v817_v7 = vpop.permute.xlu1 %816  ;;  %v863_v12 = vsel %vm862_vm2, %v841_v11, %v861_v10 }
 0x28a   : > { %v845_v14 = vrot.slane %v814_v5, %v2565_v63  ;;  %v849_v13 = vrot.slane %v817_v7, %v2565_v63 }
 0x28c   : > { %v865_v15 = vsel %vm864_vm3, %v845_v14, %v863_v12 }
 0x28d   : > { %v823_v19 = vpop.permute.xlu1 %822  ;;  %v867_v26 = vsel %vm866_vm4, %v849_v13, %v865_v15 }
 0x28e   : > { %v857_v30 = vrot.slane %v823_v19, %v2565_v63 }
 0x291   : > { %v820_v20 = vpop.permute.xlu0 %819 }
 0x292   : > { %v853_v25 = vrot.slane %v820_v20, %v2565_v63 }
 0x294   : > { %v869_v32 = vsel %vm868_vm5, %v853_v25, %v867_v26 }
 0x295   : > { %v871_v40 = vsel %vm870_vm6, %v857_v30, %v869_v32 }
 0x296   : > { %v874_v42 = vsel %vm873_vm7, %v871_v40, -inf }
 0x297   : > { %875 = vmax.xlane.f32.xlu0 %v874_v42 }
 0x320   : > { %v876_v43 = vpop.xlane.xlu0 %875 }
 0x321   : > { %v881_v45 = vrot.slane %v876_v43, %v2425_v16  ;;  %v885_v46 = vrot.slane %v876_v43, %v2440_v23  ;;  %v889_v48 = vrot.slane %v876_v43, %v2430_v18  ;;  %v893_v60 = vrot.slane %v876_v43, %v2437_v22 }
 0x322   : > { %v897_v1 = vrot.slane %v876_v43, %v2443_v24  ;;  %v901_v4 = vrot.slane %v876_v43, %v2450_v28  ;;  %v909_v10 = vrot.slane %v876_v43, %v2515_v29 }
 0x323   : > { %v918_v49 = vsub.f32 %v784_v17, %v881_v45  ;;  %v919_v52 = vsub.f32 %v2537_v41, %v885_v46  ;;  %v920_v62 = vsub.f32 %v786_v47, %v889_v48  ;;  %v921_v2 = vsub.f32 %v2542_v44, %v893_v60 }
 0x324   : > { %v922_v5 = vsub.f32 %v788_v50, %v897_v1  ;;  %v905_v17 = vrot.slane %v876_v43, %v2520_v31  ;;  %v923_v41 = vsub.f32 %v2548_v51, %v901_v4  ;;  %v925_v50 = vsub.f32 %v2554_v55, %v909_v10 }
 0x325   : > { %v926_v59 = vmul.f32 1.442695, %v918_v49  ;;  %v928_v0 = vmul.f32 1.442695, %v919_v52  ;;  %v930_v3 = vmul.f32 1.442695, %v920_v62 }
 0x326   : > { %v932_v7 = vmul.f32 1.442695, %v921_v2  ;;  %v934_v9 = vmul.f32 1.442695, %v922_v5  ;;  %v924_v14 = vsub.f32 %v2560_v58, %v905_v17  ;;  %v936_v44 = vmul.f32 1.442695, %v923_v41 }
 0x327   : > { %2175 = vpow2.f32 %v926_v59  ;;  %v940_v51 = vmul.f32 1.442695, %v925_v50 }
 0x328   : > { %2177 = vpow2.f32 %v928_v0  ;;  %v938_v12 = vmul.f32 1.442695, %v924_v14 }
 0x329   : > { %2179 = vpow2.f32 %v930_v3 }
 0x32a   : > { %2181 = vpow2.f32 %v932_v7 }
 0x32b   : > { %2183 = vpow2.f32 %v934_v9  ;;  %v2290_v9 = vmov 0.0  }
 0x32c   : > { %2185 = vpow2.f32 %v936_v44  ;;  %2076 = vmatprep.subr.mxu1 %v2290_v9  ;;  %2078 = vmatprep.mubr.msk.f32.mxu1 %vm2291_vm8, %v2290_v9 }
 0x32d   : > { %2187 = vpow2.f32 %v938_v12  ;;  %2077 = vmatpush3.msra.mxu1 %v2470_v53 }
 0x32e   : > { %2189 = vpow2.f32 %v940_v51  ;;  %2081 = vmatprep.subr.mxu1 %v2290_v9 }
 0x334   : > { %v2176_v47 = vpop.eup %2175 }
 0x335   : > { %951 = vperm.xlu1 %2173, %v2176_v47   ;;  %v2178_v11 = vpop.eup %2177 }
 0x336   : > { %v2180_v13 = vpop.eup %2179 }
 0x337   : > { %v2182_v15 = vpop.eup %2181 }
 0x338   : > { %v2184_v19 = vpop.eup %2183 }
 0x339   : > { %954 = vperm.xlu1 %2173, %v2178_v11   ;;  %v2596_v20 = vpop.eup %2185 }
 0x33a   : > { %v2599_v58 = vpop.eup %2187 }
 0x33b   : > { %v2602_v55 = vpop.eup %2189 }
 0x33d   : > { %957 = vperm.xlu1 %2173, %v2180_v13  }
 0x341   : > { %960 = vperm.xlu1 %2173, %v2182_v15  }
 0x345   : > { %963 = vperm.xlu1 %2173, %v2184_v19  }
 0x349   : > { %966 = vperm.xlu1 %2173, %v2596_v20  }
 0x34d   : > { %969 = vperm.xlu1 %2173, %v2599_v58  }
 0x351   : > { %972 = vperm.xlu1 %2173, %v2602_v55  }
 0x3b0   : > { %v952_v25 = vpop.permute.xlu1 %951 }
 0x3b1   : > { %v977_v46 = vrot.slane %v952_v25, %v2565_v63 }
 0x3b4   : > { %v955_v26 = vpop.permute.xlu1 %954 }
 0x3b5   : > { %v981_v43 = vrot.slane %v955_v26, %v2565_v63 }
 0x3b7   : > { %v1006_v59 = vsel %vm858_vm0, %v981_v43, %v977_v46 }
 0x3b8   : > { %v958_v30 = vpop.permute.xlu1 %957 }
 0x3b9   : > { %v985_v45 = vrot.slane %v958_v30, %v2565_v63 }
 0x3bb   : > { %v1007_v62 = vsel %vm860_vm1, %v985_v45, %v1006_v59 }
 0x3bc   : > { %v961_v32 = vpop.permute.xlu1 %960 }
 0x3bd   : > { %v989_v48 = vrot.slane %v961_v32, %v2565_v63 }
 0x3bf   : > { %v1008_v1 = vsel %vm862_vm2, %v989_v48, %v1007_v62 }
 0x3c0   : > { %v964_v40 = vpop.permute.xlu1 %963 }
 0x3c1   : > { %v993_v49 = vrot.slane %v964_v40, %v2565_v63 }
 0x3c3   : > { %v1009_v2 = vsel %vm864_vm3, %v993_v49, %v1008_v1 }
 0x3c4   : > { %v967_v42 = vpop.permute.xlu1 %966 }
 0x3c5   : > { %v997_v60 = vrot.slane %v967_v42, %v2565_v63 }
 0x3c7   : > { %v1010_v4 = vsel %vm866_vm4, %v997_v60, %v1009_v2 }
 0x3c8   : > { %v970_v52 = vpop.permute.xlu1 %969 }
 0x3c9   : > { %v1001_v0 = vrot.slane %v970_v52, %v2565_v63 }
 0x3cb   : > { %v1011_v7 = vsel %vm868_vm5, %v1001_v0, %v1010_v4 }
 0x3cc   : > { %v973_v3 = vpop.permute.xlu1 %972 }
 0x3cd   : > { %v1005_v5 = vrot.slane %v973_v3, %v2565_v63 }
 0x3cf   : > { %v1012_v17 = vsel %vm870_vm6, %v1005_v5, %v1011_v7 }
 0x3d0   : > { %v1014_v41 = vsel %vm873_vm7, %v1012_v17, 0.0 }
 0x3d1   : > { %1015 = vadd.xlane.f32.xlu0 %v1014_v41 }
 0x45a   : > { %v1016_v10 = vpop.xlane.xlu0 %1015 }
 0x45b   : > { %2191 = vrcp.f32 %v1016_v10 }
 0x468   : > { %v2192_v14 = vpop.eup %2191 }
 0x469   : > { %v1026_v44 = vrot.slane %v2192_v14, %v2440_v23  ;;  %v1022_v50 = vrot.slane %v2192_v14, %v2425_v16  ;;  %v1030_v12 = vrot.slane %v2192_v14, %v2430_v18  ;;  %v1034_v53 = vrot.slane %v2192_v14, %v2437_v22 }
 0x46a   : > { %v1038_v18 = vrot.slane %v2192_v14, %v2443_v24 }
 0x46b   : > { %v1060_v51 = vmul.f32 %v2178_v11, %v1026_v44  ;;  %v1059_v25 = vmul.f32 %v2176_v47, %v1022_v50  ;;  %v1061_v32 = vmul.f32 %v2180_v13, %v1030_v12  ;;  %v1062_v16 = vmul.f32 %v2182_v15, %v1034_v53 }
 0x46c   : > { %v1063_v47 = vmul.f32 %v2184_v19, %v1038_v18  ;;  %v1046_v11 = vrot.slane %v2192_v14, %v2520_v31  ;;  %v1050_v15 = vrot.slane %v2192_v14, %v2515_v29 }
 0x46d   : > { %v1141_v26 = vmul.f32 %v1060_v51, %v2530_v37  ;;  %v1140_v30 = vmul.f32 %v1059_v25, %v2524_v33  ;;  %v1142_v23 = vmul.f32 %v1061_v32, %v2526_v34  ;;  %v1143_v37 = vmul.f32 %v1062_v16, %v2528_v35 }
 0x46e   : > { %v1042_v33 = vrot.slane %v2192_v14, %v2450_v28  ;;  %v1144_v22 = vmul.f32 %v1063_v47, %v2534_v39  ;;  %v1065_v34 = vmul.f32 %v2599_v58, %v1046_v11  ;;  %v1066_v35 = vmul.f32 %v2602_v55, %v1050_v15 }
 0x46f   : > { %1230 = vperm.xlu0 %2172, %v1141_v26   ;;  %1150 = vperm.xlu1 %2173, %v1140_v30  }
 0x470   : > { %v1064_v13 = vmul.f32 %v2596_v20, %v1042_v33  ;;  %v1146_v28 = vmul.f32 %v1065_v34, %v2557_v56  ;;  %v1147_v39 = vmul.f32 %v1066_v35, %v2551_v54 }
 0x472   : > { %v1145_v24 = vmul.f32 %v1064_v13, %v2532_v38 }
 0x473   : > { %1076 = vperm.xlu0 %2172, %v1059_v25   ;;  %1310 = vperm.xlu1 %2173, %v1142_v23  }
 0x477   : > { %1082 = vperm.xlu0 %2172, %v1061_v32   ;;  %1390 = vperm.xlu1 %2173, %v1143_v37  }
 0x47b   : > { %1088 = vperm.xlu0 %2172, %v1063_v47   ;;  %1470 = vperm.xlu1 %2173, %v1144_v22  }
 0x47f   : > { %1094 = vperm.xlu0 %2172, %v1065_v34   ;;  %1550 = vperm.xlu1 %2173, %v1145_v24  }
 0x483   : > { %1630 = vperm.xlu1 %2173, %v1146_v28  }
 0x487   : > { %1710 = vperm.xlu1 %2173, %v1147_v39  }
 0x48b   : > { %1079 = vperm.xlu1 %2173, %v1060_v51  }
 0x48f   : > { %1085 = vperm.xlu1 %2173, %v1062_v16  }
 0x493   : > { %1091 = vperm.xlu1 %2173, %v1064_v13  }
 0x497   : > { %1097 = vperm.xlu1 %2173, %v1066_v35  }
 0x4ea   : > { %v1151_v31 = vpop.permute.xlu1 %1150  ;;  %v1231_v38 = vpop.permute.xlu0 %1230 }
 0x4eb   : > { %v1155_v19 = vrot.slane %v1151_v31, %v2565_v63  ;;  %v1235_v56 = vrot.slane %v1231_v38, %v2565_v63 }
 0x4ed   : > { %2079 = vmatmul.mubr.msk.f32.vlgmr.msra.gmra.mxu1 %vm873_vm7, %v1155_v19 }
 0x4ee   : > { %2082 = vmatpush3.msra.mxu1 %v2479_v61  ;;  %v1311_v29 = vpop.permute.xlu1 %1310  ;;  %2083 = vmatprep.mubr.msk.f32.mxu1 %vm2291_vm8, %v2290_v9 }
 0x4ef   : > { %2086 = vmatprep.subr.mxu1 %v2290_v9  ;;  %v1315_v20 = vrot.slane %v1311_v29, %v2565_v63 }
 0x4f1   : > { %2084 = vmatmul.mubr.msk.f32.vlgmr.msra.gmra.mxu1 %vm873_vm7, %v1235_v56 }
 0x4f2   : > { %2087 = vmatpush3.msra.mxu1 %v2474_v57  ;;  %v1391_v54 = vpop.permute.xlu1 %1390  ;;  %2088 = vmatprep.mubr.msk.f32.mxu1 %vm2291_vm8, %v2290_v9 }
 0x4f3   : > { %2091 = vmatprep.subr.mxu1 %v2290_v9  ;;  %v1395_v58 = vrot.slane %v1391_v54, %v2565_v63 }
 0x4f5   : > { %2089 = vmatmul.mubr.msk.f32.vlgmr.msra.gmra.mxu1 %vm873_vm7, %v1315_v20 }
 0x4f6   : > { %2092 = vmatpush3.msra.mxu1 %v2489_v8  ;;  %v1471_v61 = vpop.permute.xlu1 %1470  ;;  %2093 = vmatprep.mubr.msk.f32.mxu1 %vm2291_vm8, %v2290_v9  ;;  %v1077_v8 = vpop.permute.xlu0 %1076 }
 0x4f7   : > { %2096 = vmatprep.subr.mxu1 %v2290_v9  ;;  %v1475_v55 = vrot.slane %v1471_v61, %v2565_v63  ;;  %v1102_v46 = vrot.slane %v1077_v8, %v2565_v63 }
 0x4f9   : > { %2094 = vmatmul.mubr.msk.f32.vlgmr.msra.gmra.mxu1 %vm873_vm7, %v1395_v58 }
 0x4fa   : > { %2097 = vmatpush3.msra.mxu1 %v2486_v6  ;;  %v1551_v57 = vpop.permute.xlu1 %1550  ;;  %2098 = vmatprep.mubr.msk.f32.mxu1 %vm2291_vm8, %v2290_v9  ;;  %v1083_v43 = vpop.permute.xlu0 %1082 }
 0x4fb   : > { %2101 = vmatprep.subr.mxu1 %v2290_v9  ;;  %v1555_v42 = vrot.slane %v1551_v57, %v2565_v63  ;;  %v1110_v59 = vrot.slane %v1083_v43, %v2565_v63 }
 0x4fd   : > { %2099 = vmatmul.mubr.msk.f32.vlgmr.msra.gmra.mxu1 %vm873_vm7, %v1475_v55 }
 0x4fe   : > { %2102 = vmatpush3.msra.mxu1 %v2495_v21  ;;  %v1631_v40 = vpop.permute.xlu1 %1630  ;;  %2103 = vmatprep.mubr.msk.f32.mxu1 %vm2291_vm8, %v2290_v9  ;;  %v1089_v49 = vpop.permute.xlu0 %1088 }
 0x4ff   : > { %2106 = vmatprep.subr.mxu1 %v2290_v9  ;;  %v1635_v45 = vrot.slane %v1631_v40, %v2565_v63  ;;  %v1118_v1 = vrot.slane %v1089_v49, %v2565_v63 }
 0x501   : > { %2104 = vmatmul.mubr.msk.f32.vlgmr.msra.gmra.mxu1 %vm873_vm7, %v1555_v42 }
 0x502   : > { %2107 = vmatpush3.msra.mxu1 %v2499_v27  ;;  %v1711_v6 = vpop.permute.xlu1 %1710  ;;  %2108 = vmatprep.mubr.msk.f32.mxu1 %vm2291_vm8, %v2290_v9  ;;  %v1095_v3 = vpop.permute.xlu0 %1094 }
 0x503   : > { %2111 = vmatprep.subr.mxu1 %v2290_v9  ;;  %v1715_v27 = vrot.slane %v1711_v6, %v2565_v63  ;;  %v1126_v17 = vrot.slane %v1095_v3, %v2565_v63 }
 0x505   : > { %2109 = vmatmul.mubr.msk.f32.vlgmr.msra.gmra.mxu1 %vm873_vm7, %v1635_v45 }
 0x506   : > { %2112 = vmatpush3.msra.mxu1 %v2505_v36  ;;  %v1080_v21 = vpop.permute.xlu1 %1079  ;;  %2113 = vmatprep.mubr.msk.f32.mxu1 %vm2291_vm8, %v2290_v9 }
 0x507   : > { %v1106_v48 = vrot.slane %v1080_v21, %v2565_v63 }
 0x509   : > { %v1131_v52 = vsel %vm858_vm0, %v1106_v48, %v1102_v46  ;;  %2114 = vmatmul.mubr.msk.f32.vlgmr.msra.gmra.mxu1 %vm873_vm7, %v1715_v27 }
 0x50a   : > { %v1086_v60 = vpop.permute.xlu1 %1085  ;;  %v1132_v62 = vsel %vm860_vm1, %v1110_v59, %v1131_v52 }
 0x50b   : > { %v1114_v36 = vrot.slane %v1086_v60, %v2565_v63 }
 0x50d   : > { %v1133_v0 = vsel %vm862_vm2, %v1114_v36, %v1132_v62 }
 0x50e   : > { %v1092_v2 = vpop.permute.xlu1 %1091  ;;  %v1134_v5 = vsel %vm864_vm3, %v1118_v1, %v1133_v0 }
 0x50f   : > { %v1122_v4 = vrot.slane %v1092_v2, %v2565_v63 }
 0x511   : > { %v1135_v7 = vsel %vm866_vm4, %v1122_v4, %v1134_v5 }
 0x512   : > { %v1098_v41 = vpop.permute.xlu1 %1097  ;;  %v1136_v10 = vsel %vm868_vm5, %v1126_v17, %v1135_v7 }
 0x513   : > { %v1130_v9 = vrot.slane %v1098_v41, %v2565_v63 }
 0x515   : > { %v1137_v14 = vsel %vm870_vm6, %v1130_v9, %v1136_v10 }
 0x516   : > { %1139 = vst.msk [vmem:[%s387_s22] sm:$0xff] %vm873_vm7, %v1137_v14 }
 0x5ad   : > { %v1224_v44 = vpop.f32.mrf.mxu1 }
 0x5af   : > { %v2080_v50 = vpop.f32.mrf.mxu1 }
 0x5b1   : > { %v1304_v12 = vpop.f32.mrf.mxu1 }
 0x5b2   : > { %v1796_v63 = vrot.slane %v1304_v12, 7 }
 0x5b3   : > { %v2085_v51 = vpop.f32.mrf.mxu1 }
 0x5b4   : > { %v1797_v11 = vsel %vm858_vm0, %v1796_v63, %v1224_v44 }
 0x5b5   : > { %v1384_v25 = vpop.f32.mrf.mxu1 }
 0x5b6   : > { %v1798_v18 = vrot.slane %v1384_v25, 6 }
 0x5b7   : > { %v2090_v26 = vpop.f32.mrf.mxu1 }
 0x5b8   : > { %v1799_v34 = vsel %vm860_vm1, %v1798_v18, %v1797_v11 }
 0x5b9   : > { %v1464_v30 = vpop.f32.mrf.mxu1 }
 0x5ba   : > { %v1800_v47 = vrot.slane %v1464_v30, 5 }
 0x5bb   : > { %v2095_v32 = vpop.f32.mrf.mxu1 }
 0x5bc   : > { %v1801_v28 = vsel %vm862_vm2, %v1800_v47, %v1799_v34 }
 0x5bd   : > { %v1544_v53 = vpop.f32.mrf.mxu1 }
 0x5be   : > { %v1802_v33 = vrot.slane %v1544_v53, 4 }
 0x5bf   : > { %v2100_v23 = vpop.f32.mrf.mxu1 }
 0x5c0   : > { %v1803_v35 = vsel %vm864_vm3, %v1802_v33, %v1801_v28 }
 0x5c1   : > { %v1624_v16 = vpop.f32.mrf.mxu1 }
 0x5c2   : > { %v1804_v13 = vrot.slane %v1624_v16, 3 }
 0x5c3   : > { %v2105_v37 = vpop.f32.mrf.mxu1 }
 0x5c4   : > { %v1805_v31 = vsel %vm866_vm4, %v1804_v13, %v1803_v35 }
 0x5c5   : > { %v1704_v22 = vpop.f32.mrf.mxu1 }
 0x5c6   : > { %v1806_v24 = vrot.slane %v1704_v22, 2 }
 0x5c7   : > { %v2110_v15 = vpop.f32.mrf.mxu1 }
 0x5c8   : > { %v1807_v38 = vsel %vm868_vm5, %v1806_v24, %v1805_v31 }
 0x5c9   : > { %v1784_v39 = vpop.f32.mrf.mxu1 }
 0x5ca   : > { %v1808_v19 = vrot.slane %v1784_v39, 1 }
 0x5cb   : > { %v2115_v29 = vpop.f32.mrf.mxu1 }
 0x5cc   : > { %v1809_v56 = vsel %vm870_vm6, %v1808_v19, %v1807_v38 }
 0x5cd   : > { %1811 = vst [vmem:[%s357_s10] sm:$0xff] %v1809_v56 }
 0x5ce   : > { %2232 = shalt.err (!%p2229_p1)
}
 0x5cf   : > { %s2233_s22 = scalar_lea.hbm %s2719_s26, 128  ;;  %s2237_s24 = scalar_lea.hbm %s2762_s7, 256 }
 0x5d0   : > { %p2234_p2 = scmp.ne.s32.totalorder %s2719_s26, %s2233_s22  ;;  %p2238_p7 = scmp.lt.s32.totalorder %s2719_s26, %s2762_s7 }
 0x5d1   : > { %p2239_p6 = scmp.lt.s32.totalorder %s2237_s24, %s2233_s22 }
 0x5d2   : > { %p2235_p3 = pnand %p2234_p2, %p2376_p5 }
 0x5d3   : > { %p2240_p8 = por %p2239_p6, %p2238_p7 }
 0x5d4   : > { %p2236_p4 = pneg %p2235_p3 }
 0x5d6   : > { %p2241_p9 = pnand %p2240_p8, %p2236_p4 }
 0x5d8   : > { %2244 = shalt.err (!%p2241_p9)
}
 0x5d9   : > { %2120 = dma.vmem_to_hbm [thread:$0]  (%p2376_p5), %s1831_s12, 128, %s2719_s26, %s1813_s9  }
 0x5da PF: > { %p2132_p10 = scmp.ge.s32.totalorder %s2283_s30, 2  ;;  %s1845_s25 = sand.u32 1, %s2271_s27  }
 0x5db   : > { %p2767_p11 = scmp.ne.s32.totalorder %s2765_s16, 0  ;;  %s1846_s17 = scalar_lea.sflag [#allocation4], %s1845_s25 }
 0x5dd   : > { %p2127_p12 = pnand %p2132_p10, %p2767_p11 }
 0x5df   : > { %p2128_p13 = pneg %p2127_p12 }
 0x5e1   : > { %2266 = dma.done.wait (%p2128_p13), %s1846_s17, 128  }
 0x5e2   : > { %2268 = vsyncadd (%p2128_p13), %s1846_s17, 4294967168  ;;  %p20_p0 = scmp.ge.s32.totalorder %s2363_s11, 4   ;;  %s2768_s27 = smov %s2275_s28 }
 0x5e3   : > { %s2769_s28 = smov %s2279_s29  ;;  %s2770_s29 = smov %s2374_s14 }
 0x5e4   : > { %s2771_s30 = smov %s2363_s11  ;;  %22 = sbr.rel (!%p20_p0) target bundleno = 4 (0x4), region = 109 }
 0x5e9   :  { %1858 = vsyncpa [#allocation3], 1 }
 0x5ea   :  { %1860 = vsyncpa [#allocation3 + $0x1], 1 }
 0x5eb   :  { %1861 = vsyncpa [#allocation4], 1 }
 0x5ec   :  { %1863 = vsyncpa [#allocation4 + $0x1], 1 }

</bundles_post_ra>
